<compile_context>
chip_gen: v6e
topology: v6e:2x2x1
jax: 0.10.0
libtpu: 0.0.40
codegen_flags: <defaults>
</compile_context>

<pallas_src>
import functools

import jax
import jax.numpy as jnp
from jax.experimental import pallas as pl
from jax.experimental.pallas import tpu as pltpu

CLS_PAD = 128   # lane-dense classifier width inside the kernel (true #classes = 2)
HID_PAD = 128   # hidden state padded to a full 128-lane vreg width
SUBLANE = 16    # batch-tile alignment (bf16 packed-sublane friendly; multiple of 8)


def _round_up(x, m):
    return ((x + m - 1) // m) * m


def _choose_batch_tile(B, block_b):
    """Pick (tb, b_pad): sublane-aligned, never a degenerate tile, and split into
    >= 2 tiles when possible so v7x's second TensorCore gets work."""
    assert block_b % SUBLANE == 0, "block_b must be a multiple of 16"
    b_aligned = _round_up(B, SUBLANE)
    if b_aligned <= block_b:
        if b_aligned >= 2 * SUBLANE:
            tb = _round_up((b_aligned + 1) // 2, SUBLANE)   # >= 2 tiles
        else:
            tb = b_aligned                                   # tiny batch: 1 tile
    else:
        tb = block_b
    b_pad = _round_up(b_aligned, tb)
    return tb, b_pad


def rnn_classify_kernel(x_ref, wih_ref, whh_ref, b_ref, wcls_ref, bcls_ref, o_ref):
    # x_ref   : (L, TB, D)      bf16  time-major embedded tokens (batch tile)
    # wih_ref : (D, HP)         bf16  W_ih^T, output lanes zero-padded to HP
    # whh_ref : (HP, HP)        bf16  W_hh^T, zero-padded
    # b_ref   : (1, HP)         f32   b_ih + b_hh, zero-padded
    # wcls_ref: (HP, CLS_PAD)   bf16  [W_cls^T / L | 0]  (1/L pooling folded in)
    # bcls_ref: (1, CLS_PAD)    f32   [b_cls | 0]
    # o_ref   : (TB, CLS_PAD)   bf16
    L, TB, D = x_ref.shape
    HP = whh_ref.shape[0]

    # Hoisted, time-independent input projection: one big MXU matmul for all
    # timesteps (time-major -> the reshape is a contiguous no-op); combined bias
    # added once. Padded lanes are exactly 0.
    xw = (
        jnp.dot(
            x_ref[...].reshape(L * TB, D),
            wih_ref[...],
            preferred_element_type=jnp.float32,
        )
        + b_ref[...]
    ).reshape(L, TB, HP)

    h = jnp.zeros((TB, HP), jnp.float32)
    acc = jnp.zeros((TB, HP), jnp.float32)
    # L is small & static here -> full unroll keeps LLO scheduling visibility.
    # TODO(synk): for L >~ 16 switch to lax.fori_loop(..., unroll=4/8) reading xw
    # from a VMEM scratch so vreg live ranges stay bounded (avoid spill-bound flip).
    for t in range(L):
        h = jnp.tanh(
            xw[t]
            + jnp.dot(
                h.astype(jnp.bfloat16),
                whh_ref[...],
                preferred_element_type=jnp.float32,
            )
        )
        acc = acc + h

    # Avg-pool scale (1/L) is pre-folded into wcls; output last dim is 128 so the
    # store is an unmasked, lane-dense vst; emitted in bf16 to halve writeback bytes.
    # Wrapper slices [:, :2].
    o_ref[...] = (
        jnp.dot(
            acc.astype(jnp.bfloat16),
            wcls_ref[...],
            preferred_element_type=jnp.float32,
        )
        + bcls_ref[...]
    ).astype(o_ref.dtype)


def init_params(key, vector_dim, n_vocab):
    ks = jax.random.split(key, 7)
    scale = 1.0 / jnp.sqrt(vector_dim)
    return {
        "embedding": jax.random.normal(ks[0], (n_vocab, vector_dim), jnp.float32),
        "w_ih": jax.random.uniform(ks[1], (vector_dim, vector_dim), jnp.float32, -scale, scale),
        "w_hh": jax.random.uniform(ks[2], (vector_dim, vector_dim), jnp.float32, -scale, scale),
        "b_ih": jax.random.uniform(ks[3], (vector_dim,), jnp.float32, -scale, scale),
        "b_hh": jax.random.uniform(ks[4], (vector_dim,), jnp.float32, -scale, scale),
        "w_cls": jax.random.uniform(ks[5], (2, vector_dim), jnp.float32, -scale, scale),
        "b_cls": jax.random.uniform(ks[6], (2,), jnp.float32, -scale, scale),
    }


def prepare_params(params, sentence_length):
    """One-time repack: transpose weights, combine biases, fold the 1/L pooling scale
    into the classifier, lane-pad the hidden dimension to 128 (weights only — the
    embedding table is NOT padded so the gather stays D-wide), cast matmul operands
    to bf16. Padded rows/cols are zero so padded lanes stay exactly 0 in-kernel."""
    D = params["w_ih"].shape[1]
    HP = max(HID_PAD, _round_up(D, 128))

    w_ih_pad = jnp.zeros((D, HP), jnp.float32).at[:, :D].set(params["w_ih"].T)
    w_hh_pad = jnp.zeros((HP, HP), jnp.float32).at[:D, :D].set(params["w_hh"].T)
    b_pad = jnp.zeros((1, HP), jnp.float32).at[0, :D].set(params["b_ih"] + params["b_hh"])
    w_cls_pad = jnp.zeros((HP, CLS_PAD), jnp.float32).at[:D, :2].set(
        params["w_cls"].T / sentence_length
    )
    b_cls_pad = jnp.zeros((1, CLS_PAD), jnp.float32).at[0, :2].set(params["b_cls"])

    return {
        "embedding": params["embedding"].astype(jnp.bfloat16),   # bf16 halves gather traffic
        "w_ih_pad": w_ih_pad.astype(jnp.bfloat16),
        "w_hh_pad": w_hh_pad.astype(jnp.bfloat16),
        "b_pad": b_pad,          # f32, added once after the hoisted projection
        "w_cls_pad": w_cls_pad.astype(jnp.bfloat16),
        "b_cls_pad": b_cls_pad,  # f32
    }


@functools.partial(jax.jit, static_argnames=("block_b",))
def torch_model_forward(tokens, prepared, block_b=256):
    """tokens: (B, L) int32 -> logits (B, 2) f32 (inference path of TorchModel)."""
    # Time-major embedding gather kept as plain-JAX glue (bf16 table halves traffic).
    # TODO(synk): fuse the gather via PrefetchScalarGridSpec(num_scalar_prefetch=1)
    # + per-row DMA gather to avoid materializing (L, B, D) in HBM at realistic sizes.
    emb = jnp.take(prepared["embedding"], tokens.T, axis=0)   # (L, B, D) bf16
    L, B, D = emb.shape
    HP = prepared["w_hh_pad"].shape[0]

    tb, b_pad = _choose_batch_tile(B, block_b)
    if b_pad != B:
        emb = jnp.pad(emb, ((0, 0), (0, b_pad - B), (0, 0)))

    out = pl.pallas_call(
        rnn_classify_kernel,
        out_shape=jax.ShapeDtypeStruct((b_pad, CLS_PAD), jnp.bfloat16),
        grid_spec=pltpu.PrefetchScalarGridSpec(
            num_scalar_prefetch=0,
            grid=(b_pad // tb,),
            in_specs=[
                # Activation tile (double-buffered by default; bump to
                # pipeline_mode=pl.Buffered(3) if xprof shows exposed DMA at large tb).
                pl.BlockSpec((L, tb, D), lambda i: (0, i, 0)),
                pl.BlockSpec((D, HP), lambda i: (0, 0)),        # W_ih^T (resident)
                pl.BlockSpec((HP, HP), lambda i: (0, 0)),       # W_hh^T (resident)
                pl.BlockSpec((1, HP), lambda i: (0, 0)),        # combined bias
                pl.BlockSpec((HP, CLS_PAD), lambda i: (0, 0)),  # classifier W (1/L folded)
                pl.BlockSpec((1, CLS_PAD), lambda i: (0, 0)),   # classifier b
            ],
            out_specs=pl.BlockSpec((tb, CLS_PAD), lambda i: (i, 0)),
        ),
        compiler_params=pltpu.CompilerParams(
            # v7x: shard batch tiles across the two TensorCores; no-op on v5e/v6e.
            dimension_semantics=("parallel",),
        ),
    )(
        emb,
        prepared["w_ih_pad"],
        prepared["w_hh_pad"],
        prepared["b_pad"],
        prepared["w_cls_pad"],
        prepared["b_cls_pad"],
    )
    return out[:B, :2].astype(jnp.float32)


def reference_forward(tokens, params):
    """Pure-JAX f32 reference matching the PyTorch forward (inference path)."""
    emb = params["embedding"][tokens]
    B, L, D = emb.shape
    h = jnp.zeros((B, D), jnp.float32)
    hs = []
    for t in range(L):
        h = jnp.tanh(
            emb[:, t, :] @ params["w_ih"].T + params["b_ih"]
            + h @ params["w_hh"].T + params["b_hh"]
        )
        hs.append(h)
    pooled = jnp.mean(jnp.stack(hs, axis=1), axis=1)
    return pooled @ params["w_cls"].T + params["b_cls"]


if __name__ == "__main__":
    vector_dim = 32
    sentence_length = 8
    n_vocab = 64
    batch = 2

    key = jax.random.PRNGKey(0)
    pkey, xkey = jax.random.split(key)
    params = init_params(pkey, vector_dim, n_vocab)
    prepared = prepare_params(params, sentence_length)
    tokens = jax.random.randint(
        xkey, (batch, sentence_length), 0, n_vocab, dtype=jnp.int32
    )

    y_pred = torch_model_forward(tokens, prepared)
    jax.block_until_ready(y_pred)

    assert y_pred.shape == (batch, 2) and y_pred.dtype == jnp.float32
    assert bool(jnp.all(jnp.isfinite(y_pred)))
    y_ref = reference_forward(tokens, params)
    assert bool(jnp.allclose(y_pred, y_ref, atol=5e-2, rtol=5e-2))
    print("KERNEL_OK")
</pallas_src>

<mosaic_0001>
module attributes {stable_mosaic.version = 11 : i64} {
  func.func @rnn_classify_kernel(%arg0: i32, %arg1: memref<8x16x32xbf16, #tpu.memory_space<vmem>>, %arg2: memref<32x128xbf16, #tpu.memory_space<vmem>>, %arg3: memref<128x128xbf16, #tpu.memory_space<vmem>>, %arg4: memref<1x128xf32, #tpu.memory_space<vmem>>, %arg5: memref<128x128xbf16, #tpu.memory_space<vmem>>, %arg6: memref<1x128xf32, #tpu.memory_space<vmem>>, %arg7: memref<16x128xbf16, #tpu.memory_space<vmem>>) attributes {dimension_semantics = [#tpu.dimension_semantics<parallel>], iteration_bounds = array<i64: 1>, scalar_prefetch = 0 : i64, scratch_operands = 0 : i64, tpu.core_type = #tpu.core_type<tc>, window_params = [{transform_indices = @transform_0, window_bounds = array<i64: 8, 16, 32>}, {pipeline_mode = #tpu.pipeline_mode<synchronous>, transform_indices = @transform_1, window_bounds = array<i64: 32, 128>}, {pipeline_mode = #tpu.pipeline_mode<synchronous>, transform_indices = @transform_2, window_bounds = array<i64: 128, 128>}, {pipeline_mode = #tpu.pipeline_mode<synchronous>, transform_indices = @transform_3, window_bounds = array<i64: 1, 128>}, {pipeline_mode = #tpu.pipeline_mode<synchronous>, transform_indices = @transform_4, window_bounds = array<i64: 128, 128>}, {pipeline_mode = #tpu.pipeline_mode<synchronous>, transform_indices = @transform_5, window_bounds = array<i64: 1, 128>}, {transform_indices = @transform_6, window_bounds = array<i64: 16, 128>}]} {
    %c0 = arith.constant 0 : index
    %c0_0 = arith.constant 0 : index
    %c0_1 = arith.constant 0 : index
    %0 = vector.load %arg1[%c0, %c0_0, %c0_1] : memref<8x16x32xbf16, #tpu.memory_space<vmem>>, vector<8x16x32xbf16>
    %1 = vector.shape_cast %0 : vector<8x16x32xbf16> to vector<128x32xbf16>
    %c0_2 = arith.constant 0 : index
    %c0_3 = arith.constant 0 : index
    %2 = vector.load %arg2[%c0_2, %c0_3] : memref<32x128xbf16, #tpu.memory_space<vmem>>, vector<32x128xbf16>
    %cst = arith.constant dense<0.000000e+00> : vector<128x128xf32>
    %3 = tpu.matmul %1, %2, %cst {dimension_numbers = #tpu.dot_dimension_numbers<[1], [0], [0], [1], [0, 0, 1, 1], [], []>} : vector<128x32xbf16>, vector<32x128xbf16>, vector<128x128xf32> -> vector<128x128xf32>
    %c0_4 = arith.constant 0 : index
    %c0_5 = arith.constant 0 : index
    %4 = vector.load %arg4[%c0_4, %c0_5] : memref<1x128xf32, #tpu.memory_space<vmem>>, vector<1x128xf32>
    %5 = vector.broadcast %4 : vector<1x128xf32> to vector<128x128xf32>
    %6 = arith.addf %3, %5 : vector<128x128xf32>
    %7 = vector.shape_cast %6 : vector<128x128xf32> to vector<8x16x128xf32>
    %cst_6 = arith.constant 0.000000e+00 : f32
    %8 = vector.broadcast %cst_6 : f32 to vector<16x128xf32>
    %cst_7 = arith.constant 0.000000e+00 : f32
    %9 = vector.broadcast %cst_7 : f32 to vector<16x128xf32>
    %10 = vector.extract_strided_slice %7 {offsets = [0, 0, 0], sizes = [1, 16, 128], strides = [1, 1, 1]} : vector<8x16x128xf32> to vector<1x16x128xf32>
    %11 = vector.shape_cast %10 : vector<1x16x128xf32> to vector<16x128xf32>
    %12 = arith.truncf %8 : vector<16x128xf32> to vector<16x128xbf16>
    %c0_8 = arith.constant 0 : index
    %c0_9 = arith.constant 0 : index
    %13 = vector.load %arg3[%c0_8, %c0_9] : memref<128x128xbf16, #tpu.memory_space<vmem>>, vector<128x128xbf16>
    %cst_10 = arith.constant dense<0.000000e+00> : vector<16x128xf32>
    %14 = tpu.matmul %12, %13, %cst_10 {dimension_numbers = #tpu.dot_dimension_numbers<[1], [0], [0], [1], [0, 0, 1, 1], [], []>} : vector<16x128xbf16>, vector<128x128xbf16>, vector<16x128xf32> -> vector<16x128xf32>
    %15 = arith.addf %11, %14 : vector<16x128xf32>
    %16 = math.tanh %15 : vector<16x128xf32>
    %17 = arith.addf %9, %16 : vector<16x128xf32>
    %18 = vector.extract_strided_slice %7 {offsets = [1, 0, 0], sizes = [1, 16, 128], strides = [1, 1, 1]} : vector<8x16x128xf32> to vector<1x16x128xf32>
    %19 = vector.shape_cast %18 : vector<1x16x128xf32> to vector<16x128xf32>
    %20 = arith.truncf %16 : vector<16x128xf32> to vector<16x128xbf16>
    %c0_11 = arith.constant 0 : index
    %c0_12 = arith.constant 0 : index
    %21 = vector.load %arg3[%c0_11, %c0_12] : memref<128x128xbf16, #tpu.memory_space<vmem>>, vector<128x128xbf16>
    %cst_13 = arith.constant dense<0.000000e+00> : vector<16x128xf32>
    %22 = tpu.matmul %20, %21, %cst_13 {dimension_numbers = #tpu.dot_dimension_numbers<[1], [0], [0], [1], [0, 0, 1, 1], [], []>} : vector<16x128xbf16>, vector<128x128xbf16>, vector<16x128xf32> -> vector<16x128xf32>
    %23 = arith.addf %19, %22 : vector<16x128xf32>
    %24 = math.tanh %23 : vector<16x128xf32>
    %25 = arith.addf %17, %24 : vector<16x128xf32>
    %26 = vector.extract_strided_slice %7 {offsets = [2, 0, 0], sizes = [1, 16, 128], strides = [1, 1, 1]} : vector<8x16x128xf32> to vector<1x16x128xf32>
    %27 = vector.shape_cast %26 : vector<1x16x128xf32> to vector<16x128xf32>
    %28 = arith.truncf %24 : vector<16x128xf32> to vector<16x128xbf16>
    %c0_14 = arith.constant 0 : index
    %c0_15 = arith.constant 0 : index
    %29 = vector.load %arg3[%c0_14, %c0_15] : memref<128x128xbf16, #tpu.memory_space<vmem>>, vector<128x128xbf16>
    %cst_16 = arith.constant dense<0.000000e+00> : vector<16x128xf32>
    %30 = tpu.matmul %28, %29, %cst_16 {dimension_numbers = #tpu.dot_dimension_numbers<[1], [0], [0], [1], [0, 0, 1, 1], [], []>} : vector<16x128xbf16>, vector<128x128xbf16>, vector<16x128xf32> -> vector<16x128xf32>
    %31 = arith.addf %27, %30 : vector<16x128xf32>
    %32 = math.tanh %31 : vector<16x128xf32>
    %33 = arith.addf %25, %32 : vector<16x128xf32>
    %34 = vector.extract_strided_slice %7 {offsets = [3, 0, 0], sizes = [1, 16, 128], strides = [1, 1, 1]} : vector<8x16x128xf32> to vector<1x16x128xf32>
    %35 = vector.shape_cast %34 : vector<1x16x128xf32> to vector<16x128xf32>
    %36 = arith.truncf %32 : vector<16x128xf32> to vector<16x128xbf16>
    %c0_17 = arith.constant 0 : index
    %c0_18 = arith.constant 0 : index
    %37 = vector.load %arg3[%c0_17, %c0_18] : memref<128x128xbf16, #tpu.memory_space<vmem>>, vector<128x128xbf16>
    %cst_19 = arith.constant dense<0.000000e+00> : vector<16x128xf32>
    %38 = tpu.matmul %36, %37, %cst_19 {dimension_numbers = #tpu.dot_dimension_numbers<[1], [0], [0], [1], [0, 0, 1, 1], [], []>} : vector<16x128xbf16>, vector<128x128xbf16>, vector<16x128xf32> -> vector<16x128xf32>
    %39 = arith.addf %35, %38 : vector<16x128xf32>
    %40 = math.tanh %39 : vector<16x128xf32>
    %41 = arith.addf %33, %40 : vector<16x128xf32>
    %42 = vector.extract_strided_slice %7 {offsets = [4, 0, 0], sizes = [1, 16, 128], strides = [1, 1, 1]} : vector<8x16x128xf32> to vector<1x16x128xf32>
    %43 = vector.shape_cast %42 : vector<1x16x128xf32> to vector<16x128xf32>
    %44 = arith.truncf %40 : vector<16x128xf32> to vector<16x128xbf16>
    %c0_20 = arith.constant 0 : index
    %c0_21 = arith.constant 0 : index
    %45 = vector.load %arg3[%c0_20, %c0_21] : memref<128x128xbf16, #tpu.memory_space<vmem>>, vector<128x128xbf16>
    %cst_22 = arith.constant dense<0.000000e+00> : vector<16x128xf32>
    %46 = tpu.matmul %44, %45, %cst_22 {dimension_numbers = #tpu.dot_dimension_numbers<[1], [0], [0], [1], [0, 0, 1, 1], [], []>} : vector<16x128xbf16>, vector<128x128xbf16>, vector<16x128xf32> -> vector<16x128xf32>
    %47 = arith.addf %43, %46 : vector<16x128xf32>
    %48 = math.tanh %47 : vector<16x128xf32>
    %49 = arith.addf %41, %48 : vector<16x128xf32>
    %50 = vector.extract_strided_slice %7 {offsets = [5, 0, 0], sizes = [1, 16, 128], strides = [1, 1, 1]} : vector<8x16x128xf32> to vector<1x16x128xf32>
    %51 = vector.shape_cast %50 : vector<1x16x128xf32> to vector<16x128xf32>
    %52 = arith.truncf %48 : vector<16x128xf32> to vector<16x128xbf16>
    %c0_23 = arith.constant 0 : index
    %c0_24 = arith.constant 0 : index
    %53 = vector.load %arg3[%c0_23, %c0_24] : memref<128x128xbf16, #tpu.memory_space<vmem>>, vector<128x128xbf16>
    %cst_25 = arith.constant dense<0.000000e+00> : vector<16x128xf32>
    %54 = tpu.matmul %52, %53, %cst_25 {dimension_numbers = #tpu.dot_dimension_numbers<[1], [0], [0], [1], [0, 0, 1, 1], [], []>} : vector<16x128xbf16>, vector<128x128xbf16>, vector<16x128xf32> -> vector<16x128xf32>
    %55 = arith.addf %51, %54 : vector<16x128xf32>
    %56 = math.tanh %55 : vector<16x128xf32>
    %57 = arith.addf %49, %56 : vector<16x128xf32>
    %58 = vector.extract_strided_slice %7 {offsets = [6, 0, 0], sizes = [1, 16, 128], strides = [1, 1, 1]} : vector<8x16x128xf32> to vector<1x16x128xf32>
    %59 = vector.shape_cast %58 : vector<1x16x128xf32> to vector<16x128xf32>
    %60 = arith.truncf %56 : vector<16x128xf32> to vector<16x128xbf16>
    %c0_26 = arith.constant 0 : index
    %c0_27 = arith.constant 0 : index
    %61 = vector.load %arg3[%c0_26, %c0_27] : memref<128x128xbf16, #tpu.memory_space<vmem>>, vector<128x128xbf16>
    %cst_28 = arith.constant dense<0.000000e+00> : vector<16x128xf32>
    %62 = tpu.matmul %60, %61, %cst_28 {dimension_numbers = #tpu.dot_dimension_numbers<[1], [0], [0], [1], [0, 0, 1, 1], [], []>} : vector<16x128xbf16>, vector<128x128xbf16>, vector<16x128xf32> -> vector<16x128xf32>
    %63 = arith.addf %59, %62 : vector<16x128xf32>
    %64 = math.tanh %63 : vector<16x128xf32>
    %65 = arith.addf %57, %64 : vector<16x128xf32>
    %66 = vector.extract_strided_slice %7 {offsets = [7, 0, 0], sizes = [1, 16, 128], strides = [1, 1, 1]} : vector<8x16x128xf32> to vector<1x16x128xf32>
    %67 = vector.shape_cast %66 : vector<1x16x128xf32> to vector<16x128xf32>
    %68 = arith.truncf %64 : vector<16x128xf32> to vector<16x128xbf16>
    %c0_29 = arith.constant 0 : index
    %c0_30 = arith.constant 0 : index
    %69 = vector.load %arg3[%c0_29, %c0_30] : memref<128x128xbf16, #tpu.memory_space<vmem>>, vector<128x128xbf16>
    %cst_31 = arith.constant dense<0.000000e+00> : vector<16x128xf32>
    %70 = tpu.matmul %68, %69, %cst_31 {dimension_numbers = #tpu.dot_dimension_numbers<[1], [0], [0], [1], [0, 0, 1, 1], [], []>} : vector<16x128xbf16>, vector<128x128xbf16>, vector<16x128xf32> -> vector<16x128xf32>
    %71 = arith.addf %67, %70 : vector<16x128xf32>
    %72 = math.tanh %71 : vector<16x128xf32>
    %73 = arith.addf %65, %72 : vector<16x128xf32>
    %74 = arith.truncf %73 : vector<16x128xf32> to vector<16x128xbf16>
    %c0_32 = arith.constant 0 : index
    %c0_33 = arith.constant 0 : index
    %75 = vector.load %arg5[%c0_32, %c0_33] : memref<128x128xbf16, #tpu.memory_space<vmem>>, vector<128x128xbf16>
    %cst_34 = arith.constant dense<0.000000e+00> : vector<16x128xf32>
    %76 = tpu.matmul %74, %75, %cst_34 {dimension_numbers = #tpu.dot_dimension_numbers<[1], [0], [0], [1], [0, 0, 1, 1], [], []>} : vector<16x128xbf16>, vector<128x128xbf16>, vector<16x128xf32> -> vector<16x128xf32>
    %c0_35 = arith.constant 0 : index
    %c0_36 = arith.constant 0 : index
    %77 = vector.load %arg6[%c0_35, %c0_36] : memref<1x128xf32, #tpu.memory_space<vmem>>, vector<1x128xf32>
    %78 = vector.broadcast %77 : vector<1x128xf32> to vector<16x128xf32>
    %79 = arith.addf %76, %78 : vector<16x128xf32>
    %80 = arith.truncf %79 : vector<16x128xf32> to vector<16x128xbf16>
    %c0_37 = arith.constant 0 : index
    %c0_38 = arith.constant 0 : index
    %81 = vector.load %arg7[%c0_37, %c0_38] : memref<16x128xbf16, #tpu.memory_space<vmem>>, vector<16x128xbf16>
    tpu.vector_store %arg7[%c0_37, %c0_38], %80 {strides = array<i32>} : memref<16x128xbf16, #tpu.memory_space<vmem>>, vector<16x128xbf16>,
    return
  }
  func.func @transform_0(%arg0: i32) -> (i32, i32, i32) {
    %c0_i32 = arith.constant 0 : i32
    %c0_i32_0 = arith.constant 0 : i32
    %c0_i32_1 = arith.constant 0 : i32
    return %c0_i32, %arg0, %c0_i32_0 : i32, i32, i32
  }
  func.func @transform_1(%arg0: i32) -> (i32, i32) {
    %c0_i32 = arith.constant 0 : i32
    %c0_i32_0 = arith.constant 0 : i32
    %c0_i32_1 = arith.constant 0 : i32
    return %c0_i32, %c0_i32_0 : i32, i32
  }
  func.func @transform_2(%arg0: i32) -> (i32, i32) {
    %c0_i32 = arith.constant 0 : i32
    %c0_i32_0 = arith.constant 0 : i32
    %c0_i32_1 = arith.constant 0 : i32
    return %c0_i32, %c0_i32_0 : i32, i32
  }
  func.func @transform_3(%arg0: i32) -> (i32, i32) {
    %c0_i32 = arith.constant 0 : i32
    %c0_i32_0 = arith.constant 0 : i32
    %c0_i32_1 = arith.constant 0 : i32
    return %c0_i32, %c0_i32_0 : i32, i32
  }
  func.func @transform_4(%arg0: i32) -> (i32, i32) {
    %c0_i32 = arith.constant 0 : i32
    %c0_i32_0 = arith.constant 0 : i32
    %c0_i32_1 = arith.constant 0 : i32
    return %c0_i32, %c0_i32_0 : i32, i32
  }
  func.func @transform_5(%arg0: i32) -> (i32, i32) {
    %c0_i32 = arith.constant 0 : i32
    %c0_i32_0 = arith.constant 0 : i32
    %c0_i32_1 = arith.constant 0 : i32
    return %c0_i32, %c0_i32_0 : i32, i32
  }
  func.func @transform_6(%arg0: i32) -> (i32, i32) {
    %c0_i32 = arith.constant 0 : i32
    %c0_i32_0 = arith.constant 0 : i32
    return %arg0, %c0_i32 : i32, i32
  }
}

</mosaic_0001>

<bundles_post_ra>
// kernel: torch_model_forward.1
= control target key start
LH: loop header
LB: loop body
LE: loop exit
PB: predicated region body
PF: predicated region fallthrough
CT: control target
= control target key end

     0   :  { %v1196_v0 = vmov 0.0   ;;  %vm1197_vm0 = vmmov 0   ;;  %vm103_vm1 = vcmask 261120   ;;  %v1198_v13 = vmov 0   ;;  %s1555_s2 = inlined_call_operand.vmem [shape: bf16[128,128], index: 2, kind: input, shape index: {}]   ;;  %s1556_s1 = inlined_call_operand.vmem [shape: bf16[32,128], index: 1, kind: input, shape index: {}]   ;;  %s1557_s0 = inlined_call_operand.vmem [shape: bf16[8,16,32], index: 0, kind: input, shape index: {}]   ;;  %s1558_s3 = inlined_call_operand.vmem [shape: f32[1,128], index: 3, kind: input, shape index: {}]   ;;  %s1559_s4 = inlined_call_operand.vmem [shape: bf16[128,128], index: 4, kind: input, shape index: {}]   ;;  %s1560_s5 = inlined_call_operand.vmem [shape: f32[1,128], index: 5, kind: input, shape index: {}]   ;;  %s1561_s6 = inlined_call_operand.vmem [shape: bf16[16,128], index: 6, kind: output, shape index: {}]  }
   0x1   :  { %955 = vmatprep.subr.bf16.mxu1 %v1196_v0  ;;  %v1238_v1 = vld [vmem:[%s1555_s2 + $0x38] sm:$0xff]   ;;  %971 = vmatprep.mubr.msk.bf16.mxu1 %vm1197_vm0, %v1196_v0  ;;  %v1246_v2 = vld [vmem:[%s1555_s2 + $0x30] sm:$0xff]   ;;  %v1142_v3 = vld [vmem:[%s1556_s1 + $0x8] sm:$0xff]  }
   0x2   :  { %956 = vmatpush3.bf16.msra.mxu1 %v1238_v1  ;;  %v1255_v4 = vld [vmem:[%s1555_s2 + $0x28] sm:$0xff]   ;;  %935 = vmatprep.subr.bf16.mxu0 %v1142_v3  ;;  %v1144_v5 = vld [vmem:[%s1556_s1] sm:$0xff]   ;;  %v1279_v9 = vld [vmem:[%s1555_s2 + $0x18] sm:$0xff]  }
   0x3   :  { %957 = vmatprep.subr.bf16.mxu1 %v1196_v0  ;;  %936 = vmatpush3.bf16.msra.mxu0 %v1142_v3  ;;  %v1145_v6 = vld [vmem:[%s1557_s0] sm:$0xff]   ;;  %v1147_v8 = vld [vmem:[%s1557_s0 + $0x8] sm:$0xff]   ;;  %v1291_v10 = vld [vmem:[%s1555_s2 + $0x10] sm:$0xff]  }
   0x4   :  { %937 = vmatprep.subr.bf16.mxu0 %v1144_v5  ;;  %v1268_v7 = vld [vmem:[%s1555_s2 + $0x20] sm:$0xff]   ;;  %939 = vmatprep.mubr.msk.bf16.mxu0 %vm103_vm1, %v1145_v6  ;;  %v1300_v11 = vld [vmem:[%s1555_s2 + $0x8] sm:$0xff]   ;;  %v1150_v14 = vld [vmem:[%s1557_s0 + $0x10] sm:$0xff]  }
   0x5   :  { %v1309_v12 = vld [vmem:[%s1555_s2] sm:$0xff]   ;;  %v1151_v15 = vld [vmem:[%s1557_s0 + $0x18] sm:$0xff]   ;;  %v1153_v17 = vld [vmem:[%s1557_s0 + $0x28] sm:$0xff]  }
   0x6   :  { %958 = vmatpush3.bf16.msra.mxu1 %v1246_v2  ;;  %v1152_v16 = vld [vmem:[%s1557_s0 + $0x20] sm:$0xff]   ;;  %v1154_v18 = vld [vmem:[%s1557_s0 + $0x30] sm:$0xff]   ;;  %v1155_v19 = vld [vmem:[%s1557_s0 + $0x38] sm:$0xff]  }
   0x7   :  { %959 = vmatprep.subr.bf16.mxu1 %v1196_v0  ;;  %938 = vmatpush3.bf16.msra.mxu0 %v1144_v5  ;;  %v1371_v23 = vld [vmem:[%s1558_s3] ss:$0 sm:$0xff] }
   0x8   :  { %975 = vmatprep.subr.bf16.mxu0 %v1196_v0 }
   0xa   :  { %960 = vmatpush3.bf16.msra.mxu1 %v1255_v4  ;;  %940 = vmatmul.mubr.msk.bf16.vlgmr.msra.gmra.mxu0 %vm103_vm1, %v1147_v8 }
   0xb   :  { %961 = vmatprep.subr.bf16.mxu1 %v1196_v0  ;;  %976 = vmatpush3.bf16.msra.mxu0 %v1238_v1 }
   0xc   :  { %977 = vmatprep.subr.bf16.mxu0 %v1196_v0  ;;  %943 = vmatprep.mubr.msk.bf16.mxu0 %vm103_vm1, %v1150_v14 }
   0xe   :  { %962 = vmatpush3.bf16.msra.mxu1 %v1268_v7 }
   0xf   :  { %963 = vmatprep.subr.bf16.mxu1 %v1196_v0  ;;  %978 = vmatpush3.bf16.msra.mxu0 %v1246_v2 }
  0x10   :  { %979 = vmatprep.subr.bf16.mxu0 %v1196_v0 }
  0x12   :  { %964 = vmatpush3.bf16.msra.mxu1 %v1279_v9  ;;  %944 = vmatmul.mubr.msk.bf16.gmra.mxu0 %vm103_vm1, %v1151_v15 }
  0x13   :  { %965 = vmatprep.subr.bf16.mxu1 %v1196_v0  ;;  %980 = vmatpush3.bf16.msra.mxu0 %v1255_v4 }
  0x14   :  { %981 = vmatprep.subr.bf16.mxu0 %v1196_v0  ;;  %947 = vmatprep.mubr.msk.bf16.mxu0 %vm103_vm1, %v1152_v16 }
  0x16   :  { %966 = vmatpush3.bf16.msra.mxu1 %v1291_v10 }
  0x17   :  { %967 = vmatprep.subr.bf16.mxu1 %v1196_v0  ;;  %982 = vmatpush3.bf16.msra.mxu0 %v1268_v7 }
  0x18   :  { %983 = vmatprep.subr.bf16.mxu0 %v1196_v0 }
  0x1a   :  { %968 = vmatpush3.bf16.msra.mxu1 %v1300_v11  ;;  %948 = vmatmul.mubr.msk.bf16.gmra.mxu0 %vm103_vm1, %v1153_v17 }
  0x1b   :  { %969 = vmatprep.subr.bf16.mxu1 %v1196_v0  ;;  %984 = vmatpush3.bf16.msra.mxu0 %v1279_v9 }
  0x1c   :  { %985 = vmatprep.subr.bf16.mxu0 %v1196_v0  ;;  %951 = vmatprep.mubr.msk.bf16.mxu0 %vm103_vm1, %v1154_v18 }
  0x1e   :  { %970 = vmatpush3.bf16.msra.mxu1 %v1309_v12 }
  0x1f   :  { %995 = vmatprep.subr.bf16.mxu1 %v1196_v0  ;;  %986 = vmatpush3.bf16.msra.mxu0 %v1291_v10 }
  0x20   :  { %987 = vmatprep.subr.bf16.mxu0 %v1196_v0 }
  0x21   :  { %972 = vmatmul.mubr.bf16.vlgmr.msra.gmra.mxu1 %v1198_v13 }
  0x22   :  { %996 = vmatpush3.bf16.msra.mxu1 %v1238_v1  ;;  %1011 = vmatprep.mubr.msk.bf16.mxu1 %vm1197_vm0, %v1196_v0 }
  0x23   :  { %997 = vmatprep.subr.bf16.mxu1 %v1196_v0  ;;  %988 = vmatpush3.bf16.msra.mxu0 %v1300_v11 }
  0x24   :  { %989 = vmatprep.subr.bf16.mxu0 %v1196_v0  ;;  %952 = vmatmul.mubr.msk.bf16.gmra.mxu0 %vm103_vm1, %v1155_v19 }
  0x25   :  { %991 = vmatprep.mubr.msk.bf16.mxu0 %vm1197_vm0, %v1196_v0 }
  0x26   :  { %998 = vmatpush3.bf16.msra.mxu1 %v1246_v2 }
  0x27   :  { %999 = vmatprep.subr.bf16.mxu1 %v1196_v0  ;;  %990 = vmatpush3.bf16.msra.mxu0 %v1309_v12 }
  0x28   :  { %1015 = vmatprep.subr.bf16.mxu0 %v1196_v0 }
  0x2a   :  { %1000 = vmatpush3.bf16.msra.mxu1 %v1255_v4 }
  0x2b   :  { %1001 = vmatprep.subr.bf16.mxu1 %v1196_v0 }
  0x2e   :  { %1002 = vmatpush3.bf16.msra.mxu1 %v1268_v7 }
  0x2f   :  { %1003 = vmatprep.subr.bf16.mxu1 %v1196_v0 }
  0x32   :  { %1004 = vmatpush3.bf16.msra.mxu1 %v1279_v9 }
  0x33   :  { %1005 = vmatprep.subr.bf16.mxu1 %v1196_v0 }
  0x36   :  { %1006 = vmatpush3.bf16.msra.mxu1 %v1291_v10 }
  0x37   :  { %1007 = vmatprep.subr.bf16.mxu1 %v1196_v0 }
  0x3a   :  { %1008 = vmatpush3.bf16.msra.mxu1 %v1300_v11 }
  0x3b   :  { %1009 = vmatprep.subr.bf16.mxu1 %v1196_v0 }
  0x3e   :  { %1010 = vmatpush3.bf16.msra.mxu1 %v1309_v12 }
  0x3f   :  { %1035 = vmatprep.subr.bf16.mxu1 %v1196_v0 }
  0xca   :  { %v941_v20 = vpop.f32.mrf.mxu0 }
  0xcb   :  { %v171_v48 = vadd.f32 %v941_v20, %v1371_v23 }
  0xcc   :  { %v162_v21 = vpop.f32.mrf.mxu0 }
  0xcd   :  { %v163_v24 = vadd.f32 %v1371_v23, %v162_v21 }
  0xce   :  { %v942_v22 = vpop.f32.mrf.mxu0 }
  0xcf   :  { %v174_v52 = vadd.f32 %v942_v22, %v1371_v23 }
  0xd0   :  { %v165_v25 = vpop.f32.mrf.mxu0 }
  0xd1   :  { %v166_v29 = vadd.f32 %v1371_v23, %v165_v25 }
  0xd2   :  { %v1399_v36 = vpop.f32.mrf.mxu0 }
  0xd3   :  { %v187_v19 = vadd.f32 %v1399_v36, %v1371_v23 }
  0xd4   :  { %v178_v37 = vpop.f32.mrf.mxu0 }
  0xd5   :  { %v179_v59 = vadd.f32 %v1371_v23, %v178_v37 }
  0xd6   :  { %v1401_v38 = vpop.f32.mrf.mxu0 }
  0xd8   :  { %v181_v39 = vpop.f32.mrf.mxu0 }
  0xd9   :  { %v182_v63 = vadd.f32 %v1371_v23, %v181_v39 }
  0xda   :  { %v1403_v40 = vpop.f32.mrf.mxu0 }
  0xdc   :  { %v1405_v41 = vpop.f32.mrf.mxu0 }
  0xde   :  { %v1407_v42 = vpop.f32.mrf.mxu0 }
  0xe0   :  { %v1409_v43 = vpop.f32.mrf.mxu0 }
  0xe1   :  { %v323_v26 = vpop.f32.mrf.mxu1  ;;  %v198_v37 = vadd.f32 %v1371_v23, %v1409_v43 }
  0xe2   :  { %v330_v27 = vadd.f32 %v323_v26, %v163_v24  ;;  %v190_v24 = vadd.f32 %v1401_v38, %v1371_v23 }
  0xe3   :  { %v973_v28 = vpop.f32.mrf.mxu1 }
  0xe4   :  { %1164 = vtanh.f32 %v330_v27  ;;  %v1411_v44 = vpop.f32.mrf.mxu0 }
  0xe5   :  { %v326_v30 = vpop.f32.mrf.mxu1 }
  0xe6   :  { %v331_v31 = vadd.f32 %v326_v30, %v166_v29  ;;  %v1413_v45 = vpop.f32.mrf.mxu0 }
  0xe7   :  { %v974_v32 = vpop.f32.mrf.mxu1 }
  0xe8   :  { %1166 = vtanh.f32 %v331_v31  ;;  %v1415_v46 = vpop.f32.mrf.mxu0 }
  0xea   :  { %v1417_v47 = vpop.f32.mrf.mxu0 }
  0xf1   :  { %v1375_v33 = vpop.eup %1164 }
  0xf5   :  { %v1377_v34 = vpop.eup %1166 }
  0xf6   :  { %v336_v35 = vpack.c.bf16 %v1377_v34, %v1375_v33 }
  0xf8   :  { %992 = vmatmul.mubr.bf16.vlgmr.msra.gmra.mxu0 %v336_v35 }
  0xf9   :  { %1016 = vmatpush3.bf16.msra.mxu0 %v1238_v1  ;;  %1031 = vmatprep.mubr.msk.bf16.mxu0 %vm1197_vm0, %v1196_v0 }
  0xfa   :  { %1017 = vmatprep.subr.bf16.mxu0 %v1196_v0 }
  0xfd   :  { %1018 = vmatpush3.bf16.msra.mxu0 %v1246_v2 }
  0xfe   :  { %1019 = vmatprep.subr.bf16.mxu0 %v1196_v0 }
 0x101   :  { %1020 = vmatpush3.bf16.msra.mxu0 %v1255_v4 }
 0x102   :  { %1021 = vmatprep.subr.bf16.mxu0 %v1196_v0 }
 0x105   :  { %1022 = vmatpush3.bf16.msra.mxu0 %v1268_v7 }
 0x106   :  { %1023 = vmatprep.subr.bf16.mxu0 %v1196_v0 }
 0x109   :  { %1024 = vmatpush3.bf16.msra.mxu0 %v1279_v9 }
 0x10a   :  { %1025 = vmatprep.subr.bf16.mxu0 %v1196_v0 }
 0x10d   :  { %1026 = vmatpush3.bf16.msra.mxu0 %v1291_v10 }
 0x10e   :  { %1027 = vmatprep.subr.bf16.mxu0 %v1196_v0 }
 0x111   :  { %1028 = vmatpush3.bf16.msra.mxu0 %v1300_v11 }
 0x112   :  { %1029 = vmatprep.subr.bf16.mxu0 %v1196_v0 }
 0x115   :  { %1030 = vmatpush3.bf16.msra.mxu0 %v1309_v12 }
 0x116   :  { %1055 = vmatprep.subr.bf16.mxu0 %v1196_v0 }
 0x1b8   :  { %v371_v49 = vpop.f32.mrf.mxu0 }
 0x1b9   :  { %v378_v50 = vadd.f32 %v371_v49, %v171_v48 }
 0x1ba   :  { %v993_v51 = vpop.f32.mrf.mxu0 }
 0x1bb   :  { %1168 = vtanh.f32 %v378_v50 }
 0x1bc   :  { %v374_v53 = vpop.f32.mrf.mxu0 }
 0x1bd   :  { %v379_v54 = vadd.f32 %v374_v53, %v174_v52 }
 0x1be   :  { %v994_v55 = vpop.f32.mrf.mxu0 }
 0x1bf   :  { %1170 = vtanh.f32 %v379_v54 }
 0x1c8   :  { %v1169_v56 = vpop.eup %1168 }
 0x1c9   :  { %v382_v8 = vadd.f32 %v1169_v56, %v1375_v33  ;;  %v195_v33 = vadd.f32 %v1371_v23, %v1405_v41 }
 0x1cc   :  { %v1171_v57 = vpop.eup %1170 }
 0x1cd   :  { %v384_v58 = vpack.c.bf16 %v1171_v57, %v1169_v56  ;;  %v383_v15 = vadd.f32 %v1171_v57, %v1377_v34 }
 0x1cf   :  { %1012 = vmatmul.mubr.bf16.vlgmr.msra.gmra.mxu1 %v384_v58 }
 0x1d0   :  { %1036 = vmatpush3.bf16.msra.mxu1 %v1238_v1  ;;  %1051 = vmatprep.mubr.msk.bf16.mxu1 %vm1197_vm0, %v1196_v0 }
 0x1d1   :  { %1037 = vmatprep.subr.bf16.mxu1 %v1196_v0 }
 0x1d4   :  { %1038 = vmatpush3.bf16.msra.mxu1 %v1246_v2 }
 0x1d5   :  { %1039 = vmatprep.subr.bf16.mxu1 %v1196_v0 }
 0x1d8   :  { %1040 = vmatpush3.bf16.msra.mxu1 %v1255_v4 }
 0x1d9   :  { %1041 = vmatprep.subr.bf16.mxu1 %v1196_v0 }
 0x1dc   :  { %1042 = vmatpush3.bf16.msra.mxu1 %v1268_v7 }
 0x1dd   :  { %1043 = vmatprep.subr.bf16.mxu1 %v1196_v0 }
 0x1e0   :  { %1044 = vmatpush3.bf16.msra.mxu1 %v1279_v9 }
 0x1e1   :  { %1045 = vmatprep.subr.bf16.mxu1 %v1196_v0 }
 0x1e4   :  { %1046 = vmatpush3.bf16.msra.mxu1 %v1291_v10 }
 0x1e5   :  { %1047 = vmatprep.subr.bf16.mxu1 %v1196_v0 }
 0x1e8   :  { %1048 = vmatpush3.bf16.msra.mxu1 %v1300_v11 }
 0x1e9   :  { %1049 = vmatprep.subr.bf16.mxu1 %v1196_v0 }
 0x1ec   :  { %1050 = vmatpush3.bf16.msra.mxu1 %v1309_v12 }
 0x1ed   :  { %1075 = vmatprep.subr.bf16.mxu1 %v1196_v0 }
 0x28f   :  { %v419_v60 = vpop.f32.mrf.mxu1 }
 0x290   :  { %v426_v61 = vadd.f32 %v419_v60, %v179_v59 }
 0x291   :  { %v1013_v62 = vpop.f32.mrf.mxu1 }
 0x292   :  { %1172 = vtanh.f32 %v426_v61  ;;  %v214_v61 = vadd.f32 %v1371_v23, %v1417_v47  ;;  %v1159_v47 = vld [vmem:[%s1559_s4 + $0x20] sm:$0xff]  }
 0x293   :  { %v422_v3 = vpop.f32.mrf.mxu1 }
 0x294   :  { %v427_v5 = vadd.f32 %v422_v3, %v182_v63 }
 0x295   :  { %v1014_v6 = vpop.f32.mrf.mxu1 }
 0x296   :  { %1174 = vtanh.f32 %v427_v5 }
 0x29f   :  { %v1173_v13 = vpop.eup %1172 }
 0x2a0   :  { %v430_v14 = vadd.f32 %v1173_v13, %v382_v8 }
 0x2a3   :  { %v1175_v16 = vpop.eup %1174 }
 0x2a4   :  { %v431_v17 = vadd.f32 %v1175_v16, %v383_v15  ;;  %v432_v18 = vpack.c.bf16 %v1175_v16, %v1173_v13  ;;  %v1160_v15 = vld [vmem:[%s1559_s4 + $0x18] sm:$0xff]   ;;  %v1161_v16 = vld [vmem:[%s1559_s4 + $0x10] sm:$0xff]  }
 0x2a6   :  { %1032 = vmatmul.mubr.bf16.vlgmr.msra.gmra.mxu0 %v432_v18  ;;  %v1163_v18 = vld [vmem:[%s1559_s4] sm:$0xff]  }
 0x2a7   :  { %1056 = vmatpush3.bf16.msra.mxu0 %v1238_v1  ;;  %1071 = vmatprep.mubr.msk.bf16.mxu0 %vm1197_vm0, %v1196_v0 }
 0x2a8   :  { %1057 = vmatprep.subr.bf16.mxu0 %v1196_v0 }
 0x2ab   :  { %1058 = vmatpush3.bf16.msra.mxu0 %v1246_v2 }
 0x2ac   :  { %1059 = vmatprep.subr.bf16.mxu0 %v1196_v0 }
 0x2af   :  { %1060 = vmatpush3.bf16.msra.mxu0 %v1255_v4 }
 0x2b0   :  { %1061 = vmatprep.subr.bf16.mxu0 %v1196_v0 }
 0x2b3   :  { %1062 = vmatpush3.bf16.msra.mxu0 %v1268_v7 }
 0x2b4   :  { %1063 = vmatprep.subr.bf16.mxu0 %v1196_v0 }
 0x2b7   :  { %1064 = vmatpush3.bf16.msra.mxu0 %v1279_v9 }
 0x2b8   :  { %1065 = vmatprep.subr.bf16.mxu0 %v1196_v0 }
 0x2bb   :  { %1066 = vmatpush3.bf16.msra.mxu0 %v1291_v10 }
 0x2bc   :  { %1067 = vmatprep.subr.bf16.mxu0 %v1196_v0 }
 0x2bf   :  { %1068 = vmatpush3.bf16.msra.mxu0 %v1300_v11 }
 0x2c0   :  { %1069 = vmatprep.subr.bf16.mxu0 %v1196_v0 }
 0x2c3   :  { %1070 = vmatpush3.bf16.msra.mxu0 %v1309_v12 }
 0x2c4   :  { %1095 = vmatprep.subr.bf16.mxu0 %v1196_v0 }
 0x366   :  { %v467_v20 = vpop.f32.mrf.mxu0 }
 0x367   :  { %v474_v21 = vadd.f32 %v467_v20, %v187_v19  ;;  %v219_v19 = vadd.f32 %v1411_v44, %v1371_v23  ;;  %v826_v44 = vld [vmem:[%s1560_s5] ss:$0 sm:$0xff] }
 0x368   :  { %v1033_v22 = vpop.f32.mrf.mxu0 }
 0x369   :  { %1176 = vtanh.f32 %v474_v21 }
 0x36a   :  { %v470_v25 = vpop.f32.mrf.mxu0 }
 0x36b   :  { %v475_v26 = vadd.f32 %v470_v25, %v190_v24  ;;  %v222_v24 = vadd.f32 %v1415_v46, %v1371_v23 }
 0x36c   :  { %v1034_v27 = vpop.f32.mrf.mxu0 }
 0x36d   :  { %1178 = vtanh.f32 %v475_v26 }
 0x376   :  { %v1177_v28 = vpop.eup %1176 }
 0x377   :  { %v478_v29 = vadd.f32 %v1177_v28, %v430_v14 }
 0x37a   :  { %v1179_v30 = vpop.eup %1178 }
 0x37b   :  { %v479_v31 = vadd.f32 %v1179_v30, %v431_v17  ;;  %v480_v32 = vpack.c.bf16 %v1179_v30, %v1177_v28  ;;  %v1162_v17 = vld [vmem:[%s1559_s4 + $0x8] sm:$0xff]  }
 0x37d   :  { %1052 = vmatmul.mubr.bf16.vlgmr.msra.gmra.mxu1 %v480_v32 }
 0x37e   :  { %1076 = vmatpush3.bf16.msra.mxu1 %v1238_v1  ;;  %1091 = vmatprep.mubr.msk.bf16.mxu1 %vm1197_vm0, %v1196_v0 }
 0x37f   :  { %1077 = vmatprep.subr.bf16.mxu1 %v1196_v0 }
 0x382   :  { %1078 = vmatpush3.bf16.msra.mxu1 %v1246_v2 }
 0x383   :  { %1079 = vmatprep.subr.bf16.mxu1 %v1196_v0 }
 0x386   :  { %1080 = vmatpush3.bf16.msra.mxu1 %v1255_v4 }
 0x387   :  { %1081 = vmatprep.subr.bf16.mxu1 %v1196_v0 }
 0x38a   :  { %1082 = vmatpush3.bf16.msra.mxu1 %v1268_v7 }
 0x38b   :  { %1083 = vmatprep.subr.bf16.mxu1 %v1196_v0 }
 0x38e   :  { %1084 = vmatpush3.bf16.msra.mxu1 %v1279_v9 }
 0x38f   :  { %1085 = vmatprep.subr.bf16.mxu1 %v1196_v0 }
 0x392   :  { %1086 = vmatpush3.bf16.msra.mxu1 %v1291_v10 }
 0x393   :  { %1087 = vmatprep.subr.bf16.mxu1 %v1196_v0 }
 0x396   :  { %1088 = vmatpush3.bf16.msra.mxu1 %v1300_v11 }
 0x397   :  { %1089 = vmatprep.subr.bf16.mxu1 %v1196_v0 }
 0x39a   :  { %1090 = vmatpush3.bf16.msra.mxu1 %v1309_v12 }
 0x39b   :  { %1115 = vmatprep.subr.bf16.mxu1 %v1196_v0 }
 0x43d   :  { %v515_v34 = vpop.f32.mrf.mxu1 }
 0x43e   :  { %v522_v35 = vadd.f32 %v515_v34, %v195_v33 }
 0x43f   :  { %v1053_v36 = vpop.f32.mrf.mxu1 }
 0x440   :  { %1180 = vtanh.f32 %v522_v35 }
 0x441   :  { %v518_v38 = vpop.f32.mrf.mxu1 }
 0x442   :  { %v523_v39 = vadd.f32 %v518_v38, %v198_v37 }
 0x443   :  { %v1054_v48 = vpop.f32.mrf.mxu1 }
 0x444   :  { %1182 = vtanh.f32 %v523_v39 }
 0x44d   :  { %v1181_v49 = vpop.eup %1180 }
 0x44e   :  { %v526_v50 = vadd.f32 %v1181_v49, %v478_v29 }
 0x451   :  { %v1183_v51 = vpop.eup %1182 }
 0x452   :  { %v527_v52 = vadd.f32 %v1183_v51, %v479_v31  ;;  %v528_v53 = vpack.c.bf16 %v1183_v51, %v1181_v49 }
 0x454   :  { %1072 = vmatmul.mubr.bf16.vlgmr.msra.gmra.mxu0 %v528_v53 }
 0x455   :  { %1096 = vmatpush3.bf16.msra.mxu0 %v1238_v1  ;;  %1111 = vmatprep.mubr.msk.bf16.mxu0 %vm1197_vm0, %v1196_v0  ;;  %v203_v1 = vadd.f32 %v1403_v40, %v1371_v23  ;;  %v1157_v40 = vld [vmem:[%s1559_s4 + $0x30] sm:$0xff]  }
 0x456   :  { %1097 = vmatprep.subr.bf16.mxu0 %v1196_v0 }
 0x459   :  { %1098 = vmatpush3.bf16.msra.mxu0 %v1246_v2 }
 0x45a   :  { %1099 = vmatprep.subr.bf16.mxu0 %v1196_v0 }
 0x45d   :  { %1100 = vmatpush3.bf16.msra.mxu0 %v1255_v4 }
 0x45e   :  { %1101 = vmatprep.subr.bf16.mxu0 %v1196_v0 }
 0x461   :  { %1102 = vmatpush3.bf16.msra.mxu0 %v1268_v7 }
 0x462   :  { %1103 = vmatprep.subr.bf16.mxu0 %v1196_v0 }
 0x465   :  { %1104 = vmatpush3.bf16.msra.mxu0 %v1279_v9  ;;  %v206_v9 = vadd.f32 %v1407_v42, %v1371_v23  ;;  %v211_v42 = vadd.f32 %v1371_v23, %v1413_v45  ;;  %v1158_v45 = vld [vmem:[%s1559_s4 + $0x28] sm:$0xff]  }
 0x466   :  { %1105 = vmatprep.subr.bf16.mxu0 %v1196_v0 }
 0x469   :  { %1106 = vmatpush3.bf16.msra.mxu0 %v1291_v10 }
 0x46a   :  { %1107 = vmatprep.subr.bf16.mxu0 %v1196_v0 }
 0x46d   :  { %1108 = vmatpush3.bf16.msra.mxu0 %v1300_v11 }
 0x46e   :  { %1109 = vmatprep.subr.bf16.mxu0 %v1196_v0 }
 0x471   :  { %1110 = vmatpush3.bf16.msra.mxu0 %v1309_v12  ;;  %v1156_v12 = vld [vmem:[%s1559_s4 + $0x38] sm:$0xff]  }
 0x514   :  { %v563_v2 = vpop.f32.mrf.mxu0 }
 0x515   :  { %v570_v4 = vadd.f32 %v563_v2, %v203_v1 }
 0x516   :  { %v1073_v7 = vpop.f32.mrf.mxu0 }
 0x517   :  { %1184 = vtanh.f32 %v570_v4 }
 0x518   :  { %v566_v41 = vpop.f32.mrf.mxu0 }
 0x519   :  { %v571_v10 = vadd.f32 %v566_v41, %v206_v9 }
 0x51a   :  { %v1074_v43 = vpop.f32.mrf.mxu0 }
 0x51b   :  { %1186 = vtanh.f32 %v571_v10 }
 0x524   :  { %v1185_v54 = vpop.eup %1184 }
 0x525   :  { %v574_v11 = vadd.f32 %v1185_v54, %v526_v50 }
 0x528   :  { %v1187_v55 = vpop.eup %1186 }
 0x529   :  { %v576_v56 = vpack.c.bf16 %v1187_v55, %v1185_v54  ;;  %v575_v57 = vadd.f32 %v1187_v55, %v527_v52 }
 0x52b   :  { %1092 = vmatmul.mubr.bf16.vlgmr.msra.gmra.mxu1 %v576_v56 }
 0x52c   :  { %1131 = vmatprep.mubr.msk.bf16.mxu1 %vm1197_vm0, %v1196_v0  ;;  %1116 = vmatpush3.bf16.msra.mxu1 %v1156_v12 }
 0x52d   :  { %1117 = vmatprep.subr.bf16.mxu1 %v1196_v0 }
 0x530   :  { %1118 = vmatpush3.bf16.msra.mxu1 %v1157_v40 }
 0x531   :  { %1119 = vmatprep.subr.bf16.mxu1 %v1196_v0 }
 0x534   :  { %1120 = vmatpush3.bf16.msra.mxu1 %v1158_v45 }
 0x535   :  { %1121 = vmatprep.subr.bf16.mxu1 %v1196_v0 }
 0x538   :  { %1122 = vmatpush3.bf16.msra.mxu1 %v1159_v47 }
 0x539   :  { %1123 = vmatprep.subr.bf16.mxu1 %v1196_v0 }
 0x53c   :  { %1124 = vmatpush3.bf16.msra.mxu1 %v1160_v15 }
 0x53d   :  { %1125 = vmatprep.subr.bf16.mxu1 %v1196_v0 }
 0x540   :  { %1126 = vmatpush3.bf16.msra.mxu1 %v1161_v16 }
 0x541   :  { %1127 = vmatprep.subr.bf16.mxu1 %v1196_v0 }
 0x544   :  { %1128 = vmatpush3.bf16.msra.mxu1 %v1162_v17 }
 0x545   :  { %1129 = vmatprep.subr.bf16.mxu1 %v1196_v0 }
 0x548   :  { %1130 = vmatpush3.bf16.msra.mxu1 %v1163_v18 }
 0x5eb   :  { %v611_v58 = vpop.f32.mrf.mxu1 }
 0x5ec   :  { %v618_v59 = vadd.f32 %v611_v58, %v211_v42 }
 0x5ed   :  { %v1093_v60 = vpop.f32.mrf.mxu1 }
 0x5ee   :  { %1188 = vtanh.f32 %v618_v59 }
 0x5ef   :  { %v614_v62 = vpop.f32.mrf.mxu1 }
 0x5f0   :  { %v619_v63 = vadd.f32 %v614_v62, %v214_v61 }
 0x5f1   :  { %v1094_v3 = vpop.f32.mrf.mxu1 }
 0x5f2   :  { %1190 = vtanh.f32 %v619_v63 }
 0x5fb   :  { %v1189_v5 = vpop.eup %1188 }
 0x5fc   :  { %v622_v6 = vadd.f32 %v1189_v5, %v574_v11 }
 0x5ff   :  { %v1191_v8 = vpop.eup %1190 }
 0x600   :  { %v624_v13 = vpack.c.bf16 %v1191_v8, %v1189_v5  ;;  %v623_v14 = vadd.f32 %v1191_v8, %v575_v57 }
 0x602   :  { %1112 = vmatmul.mubr.bf16.vlgmr.msra.gmra.mxu0 %v624_v13 }
 0x6c2   :  { %v659_v20 = vpop.f32.mrf.mxu0 }
 0x6c3   :  { %v666_v21 = vadd.f32 %v659_v20, %v219_v19 }
 0x6c4   :  { %v1113_v22 = vpop.f32.mrf.mxu0 }
 0x6c5   :  { %1192 = vtanh.f32 %v666_v21 }
 0x6c6   :  { %v662_v25 = vpop.f32.mrf.mxu0 }
 0x6c7   :  { %v667_v26 = vadd.f32 %v662_v25, %v222_v24 }
 0x6c8   :  { %v1114_v27 = vpop.f32.mrf.mxu0 }
 0x6c9   :  { %1194 = vtanh.f32 %v667_v26 }
 0x6d2   :  { %v1193_v28 = vpop.eup %1192 }
 0x6d3   :  { %v670_v29 = vadd.f32 %v1193_v28, %v622_v6 }
 0x6d6   :  { %v1195_v30 = vpop.eup %1194 }
 0x6d7   :  { %v671_v31 = vadd.f32 %v1195_v30, %v623_v14 }
 0x6d9   :  { %v672_v0 = vpack.c.bf16 %v671_v31, %v670_v29 }
 0x6db   :  { %1132 = vmatmul.mubr.bf16.vlgmr.msra.gmra.mxu1 %v672_v0 }
 0x79b   :  { %v778_v32 = vpop.f32.mrf.mxu1 }
 0x79c   :  { %v779_v35 = vadd.f32 %v826_v44, %v778_v32 }
 0x79d   :  { %v1133_v33 = vpop.f32.mrf.mxu1 }
 0x79f   :  { %v781_v34 = vpop.f32.mrf.mxu1 }
 0x7a0   :  { %v782_v23 = vadd.f32 %v826_v44, %v781_v34 }
 0x7a1   :  { %v1134_v46 = vpop.f32.mrf.mxu1 }
 0x7a2   :  { %v842_v36 = vpack.c.bf16 %v782_v23, %v779_v35 }
 0x7a4   :  { %843 = vst [vmem:[%s1561_s6] sm:$0xff] %v842_v36  }

</bundles_post_ra>
